<compile_context>
chip_gen: v7x
topology: tpu7x:2x2x1
jax: 0.10.0
libtpu: 0.0.40
codegen_flags: <defaults>
</compile_context>

<pallas_src>
import math
import jax
import jax.numpy as jnp
from jax.experimental import pallas as pl
from jax.experimental.pallas import tpu as pltpu

_MIB = 1024 * 1024
# Conservative cap: v7x has 64 MiB VMEM per TensorCore (v5e/v6e: 128 MiB).
_VMEM_CAP_BYTES = 40 * _MIB


# ----------------------------------------------------------------------------
# Kernels
# ----------------------------------------------------------------------------
def _ff_resident_kernel(x_ref, w0t_ref, b0_ref, w1t_ref, b1_ref, o_ref):
    """relu(x @ W0^T + b0) @ W1^T + b1 with both weight matrices VMEM-resident."""
    # fc_0: bf16 x bf16 -> f32 accumulation on the MXU; bias + ReLU in f32.
    h = jnp.dot(x_ref[...], w0t_ref[...], preferred_element_type=jnp.float32)
    h = jnp.maximum(h + b0_ref[...], 0.0)
    # fc_1: recast activation to bf16 for the second MXU matmul.
    o = jnp.dot(h.astype(w1t_ref.dtype), w1t_ref[...],
                preferred_element_type=jnp.float32)
    o_ref[...] = (o + b1_ref[...]).astype(o_ref.dtype)


def _ff_tiled_kernel(x_ref, w0t_ref, b0_ref, w1t_ref, b1_ref, o_ref, acc_ref):
    """Hidden-tiled fallback (P3 accumulator) for weights too large for VMEM."""
    j = pl.program_id(1)

    @pl.when(j == 0)
    def _init():
        acc_ref[...] = jnp.zeros_like(acc_ref)

    h = jnp.dot(x_ref[...], w0t_ref[...], preferred_element_type=jnp.float32)
    h = jnp.maximum(h + b0_ref[...], 0.0)
    acc_ref[...] += jnp.dot(h.astype(w1t_ref.dtype), w1t_ref[...],
                            preferred_element_type=jnp.float32)

    @pl.when(j == pl.num_programs(1) - 1)
    def _finalize():
        o_ref[...] = (acc_ref[...] + b1_ref[...]).astype(o_ref.dtype)


# ----------------------------------------------------------------------------
# Tiling / VMEM budgeting helpers
# ----------------------------------------------------------------------------
def _choose_tm(mp, candidates, prefer_even=True):
    """Pick a token tile. `mp` is a multiple of 128; candidates are descending."""
    divisors = [t for t in candidates if mp % t == 0]
    if not divisors:
        return 128  # unreachable: mp is a multiple of 128
    if prefer_even:
        # Even tile count lets v7x's two TensorCores split the 'parallel' axis.
        for t in divisors:
            if (mp // t) % 2 == 0:
                return t
    return divisors[0]


def _choose_th(h):
    for t in (512, 256, 128):
        if t <= h and h % t == 0:
            return t
    return h


def _resident_vmem_bytes(tm, e, h):
    bf16, f32 = 2, 4
    weights = 2 * e * h * bf16            # W0^T + W1^T (constant index -> 1 copy)
    biases = (h + e) * f32
    x_tiles = 2 * tm * e * bf16           # double-buffered input tile
    o_tiles = 2 * tm * e * f32            # double-buffered output tile
    h_tmp = tm * h * (f32 + bf16)         # fc_0 activation (f32) + bf16 recast
    o_tmp = tm * e * f32                  # fc_1 result temp
    return weights + biases + x_tiles + o_tiles + h_tmp + o_tmp


def _tiled_vmem_bytes(tm, th, e):
    bf16, f32 = 2, 4
    weights = 2 * (e * th + th * e) * bf16   # double-buffered weight slabs
    biases = 2 * (th + e) * f32
    x_tiles = 2 * tm * e * bf16
    o_tiles = 2 * tm * e * f32
    acc = tm * e * f32
    h_tmp = tm * th * (f32 + bf16)
    return weights + biases + x_tiles + o_tiles + acc + h_tmp


def _vmem_limit(est_bytes):
    return min(_VMEM_CAP_BYTES, int(est_bytes * 1.5) + 2 * _MIB)


# ----------------------------------------------------------------------------
# Wrapper
# ----------------------------------------------------------------------------
def ff_forward(x, w0, b0, w1, b1, *, force_tiled=False):
    """Forward pass of FF.

    x:  [..., E]
    w0: [H, E], b0: [H]   -- fc_0 in PyTorch Linear layout
    w1: [E, H], b1: [E]   -- fc_1 in PyTorch Linear layout
    """
    orig_shape = x.shape
    e = orig_shape[-1]
    h = w0.shape[0]
    m = 1
    for d in orig_shape[:-1]:
        m *= d
    out_dtype = x.dtype

    # Fold all leading dims into one token axis; zero-pad to a multiple of 128
    # so every token tile is MXU/sublane aligned (slice the pad off at the end).
    x2 = x.reshape(m, e)
    mp = ((m + 127) // 128) * 128
    if mp != m:
        x2 = jnp.pad(x2, ((0, mp - m), (0, 0)))

    # bf16 matmul operands, pre-transposed weights (pure A @ B on the MXU);
    # biases and all accumulation stay in f32.
    x2 = x2.astype(jnp.bfloat16)
    w0t = jnp.transpose(w0).astype(jnp.bfloat16)     # (E, H)
    w1t = jnp.transpose(w1).astype(jnp.bfloat16)     # (H, E)
    b0r = b0.reshape(1, h).astype(jnp.float32)
    b1r = b1.reshape(1, e).astype(jnp.float32)

    tm = _choose_tm(mp, (512, 256, 128), prefer_even=True)
    resident_est = _resident_vmem_bytes(tm, e, h)
    use_resident = (not force_tiled) and (_vmem_limit(resident_est)
                                          <= _VMEM_CAP_BYTES) and (
        int(resident_est * 1.5) + 2 * _MIB <= _VMEM_CAP_BYTES)

    if use_resident:
        # Fast path: weights DMA'd once, stay resident; no reduction grid axis,
        # no accumulator scratch.
        out = pl.pallas_call(
            _ff_resident_kernel,
            out_shape=jax.ShapeDtypeStruct((mp, e), out_dtype),
            grid_spec=pltpu.PrefetchScalarGridSpec(
                num_scalar_prefetch=0,
                grid=(mp // tm,),
                in_specs=[
                    pl.BlockSpec((tm, e), lambda i: (i, 0)),   # x token tile
                    pl.BlockSpec((e, h), lambda i: (0, 0)),    # W0^T (resident)
                    pl.BlockSpec((1, h), lambda i: (0, 0)),    # b0 (resident)
                    pl.BlockSpec((h, e), lambda i: (0, 0)),    # W1^T (resident)
                    pl.BlockSpec((1, e), lambda i: (0, 0)),    # b1 (resident)
                ],
                out_specs=pl.BlockSpec((tm, e), lambda i: (i, 0)),
            ),
            compiler_params=pltpu.CompilerParams(
                dimension_semantics=("parallel",),
                vmem_limit_bytes=_vmem_limit(resident_est),
            ),
        )(x2, w0t, b0r, w1t, b1r)
    else:
        # Fallback: tile the hidden (reduction) axis, accumulate in f32 VMEM.
        tm_t = _choose_tm(mp, (1024, 512, 256, 128), prefer_even=True)
        th = _choose_th(h)
        while (int(_tiled_vmem_bytes(tm_t, th, e) * 1.5) + 2 * _MIB
               > _VMEM_CAP_BYTES) and tm_t > 128:
            tm_t //= 2
        tiled_est = _tiled_vmem_bytes(tm_t, th, e)
        # TODO(synk): if profiles show exposed weight DMA here, add
        # pipeline_mode=pl.Buffered(3) to the W0^T / W1^T specs and re-sweep.
        out = pl.pallas_call(
            _ff_tiled_kernel,
            out_shape=jax.ShapeDtypeStruct((mp, e), out_dtype),
            grid_spec=pltpu.PrefetchScalarGridSpec(
                num_scalar_prefetch=0,
                grid=(mp // tm_t, h // th),
                in_specs=[
                    pl.BlockSpec((tm_t, e), lambda i, j: (i, 0)),  # x token tile
                    pl.BlockSpec((e, th), lambda i, j: (0, j)),    # W0^T slab
                    pl.BlockSpec((1, th), lambda i, j: (0, j)),    # b0 slab
                    pl.BlockSpec((th, e), lambda i, j: (j, 0)),    # W1^T slab
                    pl.BlockSpec((1, e), lambda i, j: (0, 0)),     # b1
                ],
                out_specs=pl.BlockSpec((tm_t, e), lambda i, j: (i, 0)),
                scratch_shapes=[pltpu.VMEM((tm_t, e), jnp.float32)],
            ),
            compiler_params=pltpu.CompilerParams(
                dimension_semantics=("parallel", "arbitrary"),
                vmem_limit_bytes=_vmem_limit(tiled_est),
            ),
        )(x2, w0t, b0r, w1t, b1r)

    if mp != m:
        out = out[:m]
    return out.reshape(orig_shape)


def _reference(x, w0, b0, w1, b1):
    h = jnp.maximum(x @ w0.T + b0, 0.0)
    return h @ w1.T + b1


if __name__ == "__main__":
    # Small shapes consistent with the module (emb_size=E, f_hidden_size=H).
    # S=72 -> M=144 exercises the pad-to-256 path and an even (2) token-tile count.
    B, S, E, H = 2, 72, 128, 256

    key = jax.random.PRNGKey(0)
    kx, kw0, kw1 = jax.random.split(key, 3)

    x = jax.random.normal(kx, (B, S, E), dtype=jnp.float32)

    # Deterministic param init matching the PyTorch module:
    #   weights ~ N(0, sqrt(2 / (emb_size + f_hidden_size))), biases = 0.
    std = math.sqrt(2.0 / (E + H))
    w0 = jax.random.normal(kw0, (H, E), dtype=jnp.float32) * std
    b0 = jnp.zeros((H,), dtype=jnp.float32)
    w1 = jax.random.normal(kw1, (E, H), dtype=jnp.float32) * std
    b1 = jnp.zeros((E,), dtype=jnp.float32)

    y_ref = _reference(x, w0, b0, w1, b1)

    # Resident-weight fast path (default at these shapes).
    y = ff_forward(x, w0, b0, w1, b1)
    jax.block_until_ready(y)
    assert y.shape == (B, S, E)
    # bf16 matmul operands with f32 accumulation -> loosened tolerance.
    assert jnp.allclose(y, y_ref, atol=3e-2, rtol=3e-2), float(
        jnp.max(jnp.abs(y - y_ref)))

    # Hidden-tiled accumulator fallback (used when weights exceed the VMEM budget).
    y_t = ff_forward(x, w0, b0, w1, b1, force_tiled=True)
    jax.block_until_ready(y_t)
    assert jnp.allclose(y_t, y_ref, atol=3e-2, rtol=3e-2), float(
        jnp.max(jnp.abs(y_t - y_ref)))

    print("KERNEL_OK")
</pallas_src>

<mosaic_0001>
module attributes {stable_mosaic.version = 11 : i64} {
  func.func @_ff_resident_kernel(%arg0: i32, %arg1: memref<128x128xbf16, #tpu.memory_space<vmem>>, %arg2: memref<128x256xbf16, #tpu.memory_space<vmem>>, %arg3: memref<1x256xf32, #tpu.memory_space<vmem>>, %arg4: memref<256x128xbf16, #tpu.memory_space<vmem>>, %arg5: memref<1x128xf32, #tpu.memory_space<vmem>>, %arg6: memref<128x128xf32, #tpu.memory_space<vmem>>) attributes {dimension_semantics = [#tpu.dimension_semantics<parallel>], iteration_bounds = array<i64: 2>, scalar_prefetch = 0 : i64, scratch_operands = 0 : i64, tpu.core_type = #tpu.core_type<tc>, window_params = [{transform_indices = @transform_0, window_bounds = array<i64: 128, 128>}, {pipeline_mode = #tpu.pipeline_mode<synchronous>, transform_indices = @transform_1, window_bounds = array<i64: 128, 256>}, {pipeline_mode = #tpu.pipeline_mode<synchronous>, transform_indices = @transform_2, window_bounds = array<i64: 1, 256>}, {pipeline_mode = #tpu.pipeline_mode<synchronous>, transform_indices = @transform_3, window_bounds = array<i64: 256, 128>}, {pipeline_mode = #tpu.pipeline_mode<synchronous>, transform_indices = @transform_4, window_bounds = array<i64: 1, 128>}, {transform_indices = @transform_5, window_bounds = array<i64: 128, 128>}]} {
    %c0 = arith.constant 0 : index
    %c0_0 = arith.constant 0 : index
    %0 = vector.load %arg1[%c0, %c0_0] : memref<128x128xbf16, #tpu.memory_space<vmem>>, vector<128x128xbf16>
    %c0_1 = arith.constant 0 : index
    %c0_2 = arith.constant 0 : index
    %1 = vector.load %arg2[%c0_1, %c0_2] : memref<128x256xbf16, #tpu.memory_space<vmem>>, vector<128x256xbf16>
    %cst = arith.constant dense<0.000000e+00> : vector<128x256xf32>
    %2 = tpu.matmul %0, %1, %cst {dimension_numbers = #tpu.dot_dimension_numbers<[1], [0], [0], [1], [0, 0, 1, 1], [], []>} : vector<128x128xbf16>, vector<128x256xbf16>, vector<128x256xf32> -> vector<128x256xf32>
    %c0_3 = arith.constant 0 : index
    %c0_4 = arith.constant 0 : index
    %3 = vector.load %arg3[%c0_3, %c0_4] : memref<1x256xf32, #tpu.memory_space<vmem>>, vector<1x256xf32>
    %4 = vector.broadcast %3 : vector<1x256xf32> to vector<128x256xf32>
    %5 = arith.addf %2, %4 : vector<128x256xf32>
    %cst_5 = arith.constant 0.000000e+00 : f32
    %6 = vector.broadcast %cst_5 : f32 to vector<128x256xf32>
    %7 = arith.maximumf %5, %6 : vector<128x256xf32>
    %8 = arith.truncf %7 : vector<128x256xf32> to vector<128x256xbf16>
    %c0_6 = arith.constant 0 : index
    %c0_7 = arith.constant 0 : index
    %9 = vector.load %arg4[%c0_6, %c0_7] : memref<256x128xbf16, #tpu.memory_space<vmem>>, vector<256x128xbf16>
    %cst_8 = arith.constant dense<0.000000e+00> : vector<128x128xf32>
    %10 = tpu.matmul %8, %9, %cst_8 {dimension_numbers = #tpu.dot_dimension_numbers<[1], [0], [0], [1], [0, 0, 1, 1], [], []>} : vector<128x256xbf16>, vector<256x128xbf16>, vector<128x128xf32> -> vector<128x128xf32>
    %c0_9 = arith.constant 0 : index
    %c0_10 = arith.constant 0 : index
    %11 = vector.load %arg5[%c0_9, %c0_10] : memref<1x128xf32, #tpu.memory_space<vmem>>, vector<1x128xf32>
    %12 = vector.broadcast %11 : vector<1x128xf32> to vector<128x128xf32>
    %13 = arith.addf %10, %12 : vector<128x128xf32>
    %c0_11 = arith.constant 0 : index
    %c0_12 = arith.constant 0 : index
    %14 = vector.load %arg6[%c0_11, %c0_12] : memref<128x128xf32, #tpu.memory_space<vmem>>, vector<128x128xf32>
    tpu.vector_store %arg6[%c0_11, %c0_12], %13 {strides = array<i32>} : memref<128x128xf32, #tpu.memory_space<vmem>>, vector<128x128xf32>,
    return
  }
  func.func @transform_0(%arg0: i32) -> (i32, i32) {
    %c0_i32 = arith.constant 0 : i32
    %c0_i32_0 = arith.constant 0 : i32
    return %arg0, %c0_i32 : i32, i32
  }
  func.func @transform_1(%arg0: i32) -> (i32, i32) {
    %c0_i32 = arith.constant 0 : i32
    %c0_i32_0 = arith.constant 0 : i32
    %c0_i32_1 = arith.constant 0 : i32
    return %c0_i32, %c0_i32_0 : i32, i32
  }
  func.func @transform_2(%arg0: i32) -> (i32, i32) {
    %c0_i32 = arith.constant 0 : i32
    %c0_i32_0 = arith.constant 0 : i32
    %c0_i32_1 = arith.constant 0 : i32
    return %c0_i32, %c0_i32_0 : i32, i32
  }
  func.func @transform_3(%arg0: i32) -> (i32, i32) {
    %c0_i32 = arith.constant 0 : i32
    %c0_i32_0 = arith.constant 0 : i32
    %c0_i32_1 = arith.constant 0 : i32
    return %c0_i32, %c0_i32_0 : i32, i32
  }
  func.func @transform_4(%arg0: i32) -> (i32, i32) {
    %c0_i32 = arith.constant 0 : i32
    %c0_i32_0 = arith.constant 0 : i32
    %c0_i32_1 = arith.constant 0 : i32
    return %c0_i32, %c0_i32_0 : i32, i32
  }
  func.func @transform_5(%arg0: i32) -> (i32, i32) {
    %c0_i32 = arith.constant 0 : i32
    %c0_i32_0 = arith.constant 0 : i32
    return %arg0, %c0_i32 : i32, i32
  }
}

</mosaic_0001>

<bundles_post_ra>
// kernel: tpu_custom_call.1
= control target key start
LH: loop header
LB: loop body
LE: loop exit
PB: predicated region body
PF: predicated region fallthrough
CT: control target
= control target key end

     0   :  { %10 = vsyncpa [#allocation3], 0  ;;  %s1746_s0 = inlined_call_operand.hbm [shape: bf16[256,128], index: 0, kind: input, shape index: {}]   ;;  %s1747_s1 = inlined_call_operand.hbm [shape: bf16[128,256], index: 1, kind: input, shape index: {}]   ;;  %s1748_s2 = inlined_call_operand.vmem [shape: f32[1,256], index: 2, kind: input, shape index: {}]   ;;  %s1749_s3 = inlined_call_operand.hbm [shape: bf16[256,128], index: 3, kind: input, shape index: {}]   ;;  %s1750_s4 = inlined_call_operand.vmem [shape: f32[1,128], index: 4, kind: input, shape index: {}]   ;;  %s1751_s5 = inlined_call_operand.hbm [shape: f32[256,128], index: 5, kind: output, shape index: {}]  }
   0x1   :  { %12 = vsyncpa [#allocation3 + $0x1], 0 }
   0x2   :  { %13 = vsyncpa [#allocation6], 0 }
   0x3   :  { %14 = vsyncpa [#allocation4], 0 }
   0x4   :  { %16 = vsyncpa [#allocation4 + $0x1], 0  ;;  %s1408_s18 = smov 0   ;;  %s1410_s19 = smov 0  }
   0x5   :  { %s1412_s20 = smov 0   ;;  %s1414_s21 = smov 0  }
   0x6 LB: > { %s1429_s22 = sadd.s32 4294967295, %s1365_s21   ;;  %s962_s23 = sadd.s32 4294967294, %s1365_s21   ;;  %s1365_s21 = sphi %s1414_s21, %s1771_s21   ;;  %s1361_s20 = sphi %s1412_s20, %s1770_s20   ;;  %s1357_s19 = sphi %s1410_s19, %s1769_s19   ;;  %s1353_s18 = sphi %s1408_s18, %s1768_s18  }
   0x7   : > { %p42_p0 = scmp.ne.s32.totalorder %s1357_s19, %s1353_s18  ;;  %p1752_p1 = scmp.eq.s32.totalorder %s1429_s22, 0 }
   0x8   : > { %p156_p3 = scmp.eq.s32.totalorder %s962_s23, 1  ;;  %p963_p5 = scmp.ge.s32.totalorder %s1365_s21, 1 }
   0x9   : > { %p1438_p4 = por %p1752_p1, %p42_p0  ;;  %p163_p7 = scmp.lt.s32.totalorder %s1365_s21, 3 }
   0xa   : > { %p1443_p6 = por %p156_p3, %p42_p0  ;;  %s1367_s27 = smov [#allocation5]  }
   0xb   : > { %s1755_s24 = scalar_select %p1438_p4, 1, 0 }
   0xc   : > { %s1756_s25 = scalar_select %p1443_p6, 1, 0 }
   0xd   : > { %p1448_p8 = pnand %p963_p5, %p163_p7  ;;  %s175_s28 = sshll.u32 %s1367_s27, 4  ;;  %s1452_s28 = int_to_ptr.vmem [resolvable:$true] %s175_s28 }
   0xe   : > { %s1368_s30 = smov [#allocation7]   ;;  %s1209_s9 = scalar_lea.hbm %s1747_s1, 2048 }
   0xf   : > { %p1099_p9 = pneg %p1448_p8  ;;  %s191_s6 = sshll.u32 %s1368_s30, 4  ;;  %s1463_s6 = int_to_ptr.vmem [resolvable:$true] %s191_s6 }
  0x10   : > { %p1210_p12 = scmp.ne.s32.totalorder %s1747_s1, %s1209_s9  ;;  %p1216_p5 = scmp.lt.u32.totalorder %s1209_s9, %s1747_s1 }
  0x11   : > { %p1459_p11 = pnand %p1099_p9, %p1752_p1 }
  0x13   : > { %p1211_p13 = pneg %p1459_p11 }
  0x15   : > { %p1212_p0 = pnand %p1211_p13, %p1210_p12 }
  0x17   : > { %p1213_p3 = pneg %p1212_p0 }
  0x19   : > { %p1218_p7 = pnand %p1216_p5, %p1213_p3 }
  0x1b   : > { %1221 = shalt.err (!%p1218_p7)
}
  0x1c   : > { %s1222_s14 = scalar_lea.vmem %s1452_s28, 2048  ;;  %p1230_p2 = scmp.lt.s32.totalorder %s1452_s28, %s1452_s28 }
  0x1d   : > { %p1223_p9 = scmp.ne.s32.totalorder %s1452_s28, %s1222_s14  ;;  %p1231_p12 = scmp.lt.s32.totalorder %s1222_s14, %s1222_s14 }
  0x1f   : > { %p1225_p10 = pnand %p1223_p9, %p1211_p13  ;;  %p1232_p0 = por %p1231_p12, %p1230_p2 }
  0x21   : > { %p1226_p1 = pneg %p1225_p10 }
  0x23   : > { %p1233_p6 = pnand %p1232_p0, %p1226_p1 }
  0x25   : > { %1236 = shalt.err (!%p1233_p6)
}
  0x26   : > { %s1369_s15 = smov 128   ;;  %s1370_s16 = smov 8  }
  0x27   : > { %1102 = dma.hbm_to_vmem [thread:$0]  (!%p1459_p11), %s1747_s1, 2048, %s1452_s28, [#allocation6], %s1369_s15, %s1369_s15, %s1370_s16  }
  0x28   : > { %s1237_s7 = scalar_lea.hbm %s1749_s3, 2048 }
  0x29   : > { %p1238_p2 = scmp.ne.s32.totalorder %s1749_s3, %s1237_s7  ;;  %p1244_p10 = scmp.lt.u32.totalorder %s1237_s7, %s1749_s3 }
  0x2b   : > { %p1240_p1 = pnand %p1238_p2, %p1211_p13 }
  0x2d   : > { %p1241_p6 = pneg %p1240_p1 }
  0x2f   : > { %p1246_p3 = pnand %p1244_p10, %p1241_p6 }
  0x31   : > { %1249 = shalt.err (!%p1246_p3)
}
  0x32   : > { %s1250_s28 = scalar_lea.vmem %s1463_s6, 2048  ;;  %p1258_p12 = scmp.lt.s32.totalorder %s1463_s6, %s1463_s6 }
  0x33   : > { %p1251_p5 = scmp.ne.s32.totalorder %s1463_s6, %s1250_s28  ;;  %p1259_p0 = scmp.lt.s32.totalorder %s1250_s28, %s1250_s28 }
  0x35   : > { %p1253_p7 = pnand %p1251_p5, %p1211_p13  ;;  %p1260_p2 = por %p1259_p0, %p1258_p12 }
  0x37   : > { %p1254_p9 = pneg %p1253_p7 }
  0x39   : > { %p1261_p1 = pnand %p1260_p2, %p1254_p9 }
  0x3b   : > { %1264 = shalt.err (!%p1261_p1)
}
  0x3c   : > { %s1371_s12 = smov 64   ;;  %s1372_s13 = smov 4  }
  0x3d   : > { %1105 = dma.hbm_to_vmem [thread:$0]  (!%p1459_p11), %s1749_s3, 2048, %s1463_s6, [#allocation6], %s1371_s12, %s1371_s12, %s1372_s13  }
  0x3e   : > { %s1521_s16 = sadd.s32 1, %s1365_s21   ;;  %s29_s23 = sadd.s32 1, %s1361_s20 }
  0x3f   : > { %s26_s17 = ssub.s32 %s1365_s21, %s1521_s16  ;;  %p36_p6 = scmp.ne.s32.totalorder %s1361_s20, %s1357_s19 }
  0x40   : > { %p27_p13 = scmp.eq.s32.totalorder %s26_s17, 0  ;;  %p37_p10 = scmp.eq.s32.totalorder %s1365_s21, 0 }
  0x41   : > { %p1759_p5 = scmp.eq.s32.totalorder %s1429_s22, 1  ;;  %p1116_p9 = scmp.lt.s32.totalorder %s1365_s21, 2 }
  0x42   : > { %s1530_s27 = scalar_select %p27_p13, %s1361_s20, %s29_s23  }
  0x43   : > { %p38_p3 = por %p37_p10, %p36_p6  ;;  %p1534_p7 = por %p1759_p5, %p36_p6 }
  0x44   : > { %s208_s30 = sand.u32 1, %s1361_s20   ;;  %s1021_s6 = sshll.u32 %s1365_s21, 10 }
  0x45   : > { %s1760_s29 = scalar_select %p1534_p7, 1, 0 }
  0x46   : > { %s967_s7 = sshll.u32 %s208_s30, 6  ;;  %s1544_s10 = scalar_lea.hbm %s1746_s0, %s1021_s6 }
  0x47   : > { %s212_s11 = scalar_lea.vmem [#allocation2], %s967_s7  ;;  %p1548_p11 = pnand %p1116_p9, %p38_p3 }
  0x48   : > { %s219_s28 = sshll.u32 %s212_s11, 4  ;;  %s1552_s15 = scalar_lea.sflag [#allocation3], %s208_s30  ;;  %s1546_s28 = int_to_ptr.vmem [resolvable:$true] %s219_s28 }
  0x49   : > { %s1265_s17 = scalar_lea.hbm %s1544_s10, 1024  ;;  %p1267_p0 = pneg %p1548_p11 }
  0x4a   : > { %p1266_p12 = scmp.ne.s32.totalorder %s1544_s10, %s1265_s17  ;;  %s1270_s6 = scalar_lea.hbm %s1746_s0, 2048 }
  0x4b   : > { %p1271_p13 = scmp.lt.u32.totalorder %s1544_s10, %s1746_s0  ;;  %p1272_p6 = scmp.lt.u32.totalorder %s1270_s6, %s1265_s17 }
  0x4c   : > { %p1268_p2 = pnand %p1267_p0, %p1266_p12  ;;  %p1274_p3 = scmp.lt.u32.totalorder %s1265_s17, %s1544_s10 }
  0x4d   : > { %p1273_p10 = por %p1272_p6, %p1271_p13 }
  0x4e   : > { %p1269_p1 = pneg %p1268_p2 }
  0x4f   : > { %p1275_p5 = por %p1274_p3, %p1273_p10 }
  0x51   : > { %p1276_p9 = pnand %p1275_p5, %p1269_p1 }
  0x53   : > { %1279 = shalt.err (!%p1276_p9)
}
  0x54   : > { %s1280_s30 = scalar_lea.vmem %s1546_s28, 1024  ;;  %s1373_s11 = smov [#allocation2]  }
  0x55   : > { %p1281_p12 = scmp.ne.s32.totalorder %s1546_s28, %s1280_s30  ;;  %s1285_s23 = sshll.u32 %s1373_s11, 4  ;;  %s1286_s23 = int_to_ptr.vmem [resolvable:$false] %s1285_s23 }
  0x56   : > { %s1287_s7 = scalar_lea.vmem %s1286_s23, 2048  ;;  %p1288_p4 = scmp.lt.s32.totalorder %s1546_s28, %s1286_s23 }
  0x57   : > { %p1283_p2 = pnand %p1281_p12, %p1267_p0  ;;  %p1289_p13 = scmp.lt.s32.totalorder %s1287_s7, %s1280_s30 }
  0x59   : > { %p1284_p7 = pneg %p1283_p2  ;;  %p1290_p6 = por %p1289_p13, %p1288_p4 }
  0x5b   : > { %p1291_p10 = pnand %p1290_p6, %p1284_p7 }
  0x5d   : > { %1294 = shalt.err (!%p1291_p10)
}
  0x5e   : > { %1109 = dma.hbm_to_vmem [thread:$0]  (!%p1548_p11), %s1544_s10, 1024, %s1546_s28, %s1552_s15, %s1371_s12, %s1371_s12, %s1372_s13  }
  0x5f   : > { %231 = sbr.rel (%p1448_p8) target bundleno = 651 (0x28b), region = 40  ;;  %s1586_s17 = sand.u32 (!%p1448_p8), 1, %s1357_s19  }
  0x60   : > { %s971_s6 = sshll.u32 (!%p1448_p8), %s1586_s17, 6  ;;  %s234_s8 = scalar_lea.sflag (!%p1448_p8), [#allocation3], %s1586_s17 }
  0x61   : > { %s1590_s9 = scalar_lea.vmem (!%p1448_p8), [#allocation2], %s971_s6  ;;  %p1762_p4 = scmp.ne.s32.totalorder (!%p1448_p8), %s1755_s24, 0 }
  0x66   : > { %1340 = dma.done.wait (%p1762_p4), %s234_s8, 1024  }
  0x67   : > { %1342 = vsyncadd (%p1762_p4), %s234_s8, 4294966272  ;;  %p1763_p7 = scmp.eq.s32.totalorder %s1429_s22, 0 }
  0x69   : > { %1344 = dma.done.wait (%p1763_p7), [#allocation6], 4096   ;;  %p1764_p8 = pmov %p1763_p7 }
  0x6a   : > { %v1374_v0 = vmov 0   ;;  %v1161_v1 = vld [vmem:[#allocation5 + $0x4] ss:$8 sps:$4 sm:$0xff]   ;;  %v1163_v2 = vld [vmem:[#allocation5] ss:$8 sps:$4 sm:$0xff]   ;;  %v1197_v19 = vld [vmem:[#allocation7 + $0x50] sm:$0xff]   ;;  %v309_v41 = vlaneseq }
  0x6b   : > { %1346 = vsyncadd (%p1764_p8), [#allocation6], 4294963200  ;;  %479 = vmatprep.mubr.bf16.mxu0 %v1374_v0  ;;  %447 = vmatprep.subr.bf16.mxu0 %v1161_v1  ;;  %v1164_v3 = vld [vmem:[#allocation5 + $0x14] ss:$8 sps:$4 sm:$0xff]   ;;  %v1166_v4 = vld [vmem:[#allocation5 + $0x10] ss:$8 sps:$4 sm:$0xff]  }
  0x6c   : > { %448 = vmatpush1.bf16.msra.mxu0 %v1163_v2  ;;  %v1167_v5 = vld [vmem:[#allocation5 + $0x24] ss:$8 sps:$4 sm:$0xff]   ;;  %v1169_v6 = vld [vmem:[#allocation5 + $0x20] ss:$8 sps:$4 sm:$0xff]   ;;  %v1170_v7 = vld [vmem:[#allocation5 + $0x34] ss:$8 sps:$4 sm:$0xff]  }
  0x6d   : > { %449 = vmatprep.subr.bf16.mxu0 %v1164_v3  ;;  %v1172_v8 = vld [vmem:[#allocation5 + $0x30] ss:$8 sps:$4 sm:$0xff]   ;;  %v1173_v9 = vld [vmem:[#allocation5 + $0x44] ss:$8 sps:$4 sm:$0xff]   ;;  %v1175_v10 = vld [vmem:[#allocation5 + $0x40] ss:$8 sps:$4 sm:$0xff]  }
  0x6e   : > { %v1176_v11 = vld [vmem:[#allocation5 + $0x54] ss:$8 sps:$4 sm:$0xff]   ;;  %v1178_v12 = vld [vmem:[#allocation5 + $0x50] ss:$8 sps:$4 sm:$0xff]   ;;  %v1179_v13 = vld [vmem:[#allocation5 + $0x64] ss:$8 sps:$4 sm:$0xff]  }
  0x6f   : > { %v1193_v14 = vld [vmem:[#allocation7 + $0x40] sm:$0xff]   ;;  %v1195_v17 = vld [vmem:[#allocation7 + $0x48] sm:$0xff]   ;;  %v1182_v20 = vld [vmem:[#allocation5 + $0x74] ss:$8 sps:$4 sm:$0xff]   ;;  %v310_v42 = vshrl.u32 %v309_v41, 7  ;;  %s974_s12 = sshll.u32 %s1586_s17, 7 }
  0x70   : > { %450 = vmatpush1.bf16.msra.mxu0 %v1166_v4  ;;  %v1194_v15 = vld [vmem:[#allocation7] sm:$0xff]   ;;  %1023 = vmatprep.subr.bf16.mxu1 %v1193_v14  ;;  %v1196_v18 = vld [vmem:[#allocation7 + $0x8] sm:$0xff]   ;;  %v1184_v21 = vld [vmem:[#allocation5 + $0x70] ss:$8 sps:$4 sm:$0xff]   ;;  %s1662_s28 = scalar_lea.vmem [#allocation8], %s974_s12  ;;  %s1022_s14 = sshll.u32 %s1429_s22, 11 }
  0x71   : > { %451 = vmatprep.subr.bf16.mxu0 %v1167_v5  ;;  %v1181_v16 = vld [vmem:[#allocation5 + $0x60] ss:$8 sps:$4 sm:$0xff]   ;;  %1024 = vmatpush3.bf16.msra.mxu1 %v1194_v15  ;;  %v1198_v22 = vld [vmem:[#allocation7 + $0x10] sm:$0xff]   ;;  %v1199_v23 = vld [vmem:[#allocation7 + $0x58] sm:$0xff]   ;;  %v311_v43 = vsub.s32 0, %v310_v42  ;;  %v315_v45 = vsub.s32 1, %v310_v42  ;;  %s1697_s23 = scalar_lea.hbm %s1751_s5, %s1022_s14 }
  0x72   : > { %1025 = vmatprep.subr.bf16.mxu1 %v1195_v17  ;;  %v1185_v24 = vld [vmem:[%s1590_s9] sm:$0xff]   ;;  %v1200_v25 = vld [vmem:[#allocation7 + $0x18] sm:$0xff]   ;;  %v1203_v28 = vld [vmem:[#allocation7 + $0x68] sm:$0xff]   ;;  %s870_s15 = sshll.u32 %s1662_s28, 4  ;;  %s857_s22 = scalar_lea.sflag [#allocation4], %s1586_s17  ;;  %s1699_s15 = int_to_ptr.vmem [resolvable:$true] %s870_s15 }
  0x73   : > { %v1201_v26 = vld [vmem:[#allocation7 + $0x60] sm:$0xff]   ;;  %v1186_v29 = vld [vmem:[%s1590_s9 + $0x8] sm:$0xff]   ;;  %v1187_v30 = vld [vmem:[%s1590_s9 + $0x10] sm:$0xff]   ;;  %s1295_s7 = scalar_lea.vmem %s1699_s15, 2048  ;;  %p1765_p0 = scmp.ne.s32.totalorder %s1760_s29, 0 }
  0x74   : > { %452 = vmatpush1.bf16.msra.mxu0 %v1169_v6  ;;  %v1202_v27 = vld [vmem:[#allocation7 + $0x20] sm:$0xff]   ;;  %v1188_v31 = vld [vmem:[%s1590_s9 + $0x18] sm:$0xff]   ;;  %v1190_v33 = vld [vmem:[%s1590_s9 + $0x28] sm:$0xff]   ;;  %p1296_p11 = scmp.ne.s32.totalorder %s1699_s15, %s1295_s7  ;;  %s1375_s6 = smov [#allocation8]  }
  0x75   : > { %453 = vmatprep.subr.bf16.mxu0 %v1170_v7  ;;  %1026 = vmatpush3.bf16.msra.mxu1 %v1196_v18  ;;  %v1189_v32 = vld [vmem:[%s1590_s9 + $0x20] sm:$0xff]   ;;  %v1191_v34 = vld [vmem:[%s1590_s9 + $0x30] sm:$0xff]   ;;  %v1192_v35 = vld [vmem:[%s1590_s9 + $0x38] sm:$0xff]   ;;  %s1299_s8 = sshll.u32 %s1375_s6, 4  ;;  %s1300_s8 = int_to_ptr.vmem [resolvable:$false] %s1299_s8 }
  0x76   : > { %1027 = vmatprep.subr.bf16.mxu1 %v1197_v19  ;;  %v1204_v36 = vld [vmem:[#allocation7 + $0x28] sm:$0xff]   ;;  %v1205_v37 = vld [vmem:[#allocation7 + $0x70] sm:$0xff]   ;;  %v1207_v39 = vld [vmem:[#allocation7 + $0x78] sm:$0xff]   ;;  %p1297_p1 = pnand %p1296_p11, %p1765_p0  ;;  %s1301_s9 = scalar_lea.vmem %s1300_s8, 4096 }
  0x77   : > { %v1206_v38 = vld [vmem:[#allocation7 + $0x30] sm:$0xff]   ;;  %v1208_v40 = vld [vmem:[#allocation7 + $0x38] sm:$0xff]   ;;  %v307_v44 = vld [vmem:[%s1748_s2] sm:$0x3]  ;;  %p1302_p5 = scmp.lt.s32.totalorder %s1699_s15, %s1300_s8  ;;  %p1303_p9 = scmp.lt.s32.totalorder %s1301_s9, %s1295_s7 }
  0x78   : > { %454 = vmatpush1.bf16.msra.mxu0 %v1172_v8  ;;  %v1619_v46 = vrot.slane %v307_v44, %v311_v43  ;;  %v1621_v47 = vrot.slane %v307_v44, %v315_v45  ;;  %p1298_p3 = pneg %p1297_p1 }
  0x79   : > { %455 = vmatprep.subr.bf16.mxu0 %v1173_v9  ;;  %1028 = vmatpush3.bf16.msra.mxu1 %v1198_v22  ;;  %p1304_p12 = por %p1303_p9, %p1302_p5 }
  0x7a   : > { %1029 = vmatprep.subr.bf16.mxu1 %v1199_v23 }
  0x7b   : > { %p1305_p2 = pnand %p1304_p12, %p1298_p3 }
  0x7c   : > { %456 = vmatpush1.bf16.msra.mxu0 %v1175_v10 }
  0x7d   : > { %457 = vmatprep.subr.bf16.mxu0 %v1176_v11  ;;  %1030 = vmatpush3.bf16.msra.mxu1 %v1200_v25 }
  0x7e   : > { %1031 = vmatprep.subr.bf16.mxu1 %v1201_v26 }
  0x80   : > { %458 = vmatpush1.bf16.msra.mxu0 %v1178_v12 }
  0x81   : > { %459 = vmatprep.subr.bf16.mxu0 %v1179_v13  ;;  %1032 = vmatpush3.bf16.msra.mxu1 %v1202_v27 }
  0x82   : > { %1033 = vmatprep.subr.bf16.mxu1 %v1203_v28 }
  0x84   : > { %460 = vmatpush1.bf16.msra.mxu0 %v1181_v16 }
  0x85   : > { %461 = vmatprep.subr.bf16.mxu0 %v1182_v20  ;;  %1034 = vmatpush3.bf16.msra.mxu1 %v1204_v36 }
  0x86   : > { %1035 = vmatprep.subr.bf16.mxu1 %v1205_v37 }
  0x88   : > { %462 = vmatpush1.bf16.msra.mxu0 %v1184_v21 }
  0x89   : > { %1036 = vmatpush3.bf16.msra.mxu1 %v1206_v38 }
  0x8a   : > { %1037 = vmatprep.subr.bf16.mxu1 %v1207_v39 }
  0x8b   : > { %480 = vmatmul.mubr.bf16.vlgmr.msra.gmra.mrb[0].mxu0 %v1185_v24 }
  0x8c   : > { %489 = vmatprep.mubr.bf16.mxu0 %v1374_v0 }
  0x8d   : > { %1038 = vmatpush3.bf16.msra.mxu1 %v1208_v40 }
  0x93   : > { %490 = vmatmul.mubr.bf16.gmra.mrb[4].mxu0 %v1186_v29 }
  0x94   : > { %499 = vmatprep.mubr.bf16.mxu0 %v1374_v0 }
  0x9b   : > { %500 = vmatmul.mubr.bf16.gmra.mrb[8].mxu0 %v1187_v30 }
  0x9c   : > { %509 = vmatprep.mubr.bf16.mxu0 %v1374_v0 }
  0xa3   : > { %510 = vmatmul.mubr.bf16.gmra.mrb[12].mxu0 %v1188_v31 }
  0xa4   : > { %519 = vmatprep.mubr.bf16.mxu0 %v1374_v0 }
  0xab   : > { %520 = vmatmul.mubr.bf16.gmra.mrb[16].mxu0 %v1189_v32 }
  0xac   : > { %529 = vmatprep.mubr.bf16.mxu0 %v1374_v0 }
  0xb3   : > { %530 = vmatmul.mubr.bf16.gmra.mrb[20].mxu0 %v1190_v33 }
  0xb4   : > { %539 = vmatprep.mubr.bf16.mxu0 %v1374_v0 }
  0xbb   : > { %540 = vmatmul.mubr.bf16.gmra.mrb[24].mxu0 %v1191_v34 }
  0xbc   : > { %549 = vmatprep.mubr.bf16.mxu0 %v1374_v0 }
  0xc3   : > { %550 = vmatmul.mubr.bf16.gmra.mrb[28].mxu0 %v1192_v35 }
 0x15e   : > { %v481_v48 = vpop.f32.mrb[0].mxu0 }
 0x15f   : > { %v482_v49 = vadd.f32 %v481_v48, %v1619_v46  ;;  %v483_v50 = vpop.f32.mrb[1].mxu0 }
 0x160   : > { %v484_v51 = vadd.f32 %v483_v50, %v1621_v47  ;;  %v485_v52 = vpop.f32.mrb[2].mxu0 }
 0x161   : > { %v486_v53 = vadd.f32 %v485_v52, %v1619_v46  ;;  %v487_v54 = vpop.f32.mrb[3].mxu0  ;;  %v560_v56 = vmax.f32 %v482_v49, 0.0 }
 0x162   : > { %v488_v55 = vadd.f32 %v487_v54, %v1621_v47  ;;  %v561_v58 = vmax.f32 %v484_v51, 0.0 }
 0x163   : > { %v562_v57 = vmax.f32 %v486_v53, 0.0 }
 0x164   : > { %v563_v59 = vmax.f32 %v488_v55, 0.0 }
 0x165   : > { %v592_v60 = vpack.c.bf16 %v562_v57, %v560_v56 }
 0x166   : > { %v491_v61 = vpop.f32.mrb[4].mxu0  ;;  %v593_v62 = vpack.c.bf16 %v563_v59, %v561_v58 }
 0x167   : > { %v492_v63 = vadd.f32 %v491_v61, %v1619_v46  ;;  %v493_v0 = vpop.f32.mrb[5].mxu0 }
 0x168   : > { %v494_v1 = vadd.f32 %v493_v0, %v1621_v47  ;;  %v495_v2 = vpop.f32.mrb[6].mxu0  ;;  %775 = vmatprep.mubr.bf16.mxu1 %v593_v62 }
 0x169   : > { %v496_v3 = vadd.f32 %v495_v2, %v1619_v46  ;;  %v497_v4 = vpop.f32.mrb[7].mxu0  ;;  %776 = vmatmul.mubr.bf16.vlgmr.msra.gmra.mrb[0].mxu1 %v592_v60  ;;  %v564_v6 = vmax.f32 %v492_v63, 0.0 }
 0x16a   : > { %v498_v5 = vadd.f32 %v497_v4, %v1621_v47  ;;  %v565_v8 = vmax.f32 %v494_v1, 0.0 }
 0x16b   : > { %v566_v7 = vmax.f32 %v496_v3, 0.0 }
 0x16c   : > { %v567_v9 = vmax.f32 %v498_v5, 0.0 }
 0x16d   : > { %v594_v10 = vpack.c.bf16 %v566_v7, %v564_v6 }
 0x16e   : > { %v595_v11 = vpack.c.bf16 %v567_v9, %v565_v8  ;;  %v501_v12 = vpop.f32.mrb[8].mxu0 }
 0x16f   : > { %v502_v13 = vadd.f32 %v501_v12, %v1619_v46  ;;  %v503_v14 = vpop.f32.mrb[9].mxu0 }
 0x170   : > { %v504_v15 = vadd.f32 %v503_v14, %v1621_v47  ;;  %v505_v16 = vpop.f32.mrb[10].mxu0  ;;  %783 = vmatprep.mubr.bf16.mxu1 %v595_v11 }
 0x171   : > { %v506_v17 = vadd.f32 %v505_v16, %v1619_v46  ;;  %v507_v18 = vpop.f32.mrb[11].mxu0  ;;  %784 = vmatmul.mubr.bf16.gmra.mrb[4].mxu1 %v594_v10  ;;  %v568_v20 = vmax.f32 %v502_v13, 0.0 }
 0x172   : > { %v508_v19 = vadd.f32 %v507_v18, %v1621_v47  ;;  %v569_v22 = vmax.f32 %v504_v15, 0.0 }
 0x173   : > { %v570_v21 = vmax.f32 %v506_v17, 0.0 }
 0x174   : > { %v571_v23 = vmax.f32 %v508_v19, 0.0 }
 0x175   : > { %v596_v24 = vpack.c.bf16 %v570_v21, %v568_v20 }
 0x176   : > { %v597_v25 = vpack.c.bf16 %v571_v23, %v569_v22  ;;  %v511_v26 = vpop.f32.mrb[12].mxu0 }
 0x177   : > { %v512_v27 = vadd.f32 %v511_v26, %v1619_v46  ;;  %v513_v28 = vpop.f32.mrb[13].mxu0 }
 0x178   : > { %v514_v29 = vadd.f32 %v513_v28, %v1621_v47  ;;  %v515_v30 = vpop.f32.mrb[14].mxu0  ;;  %791 = vmatprep.mubr.bf16.mxu1 %v597_v25 }
 0x179   : > { %v516_v31 = vadd.f32 %v515_v30, %v1619_v46  ;;  %v517_v32 = vpop.f32.mrb[15].mxu0  ;;  %792 = vmatmul.mubr.bf16.gmra.mrb[8].mxu1 %v596_v24  ;;  %v572_v34 = vmax.f32 %v512_v27, 0.0 }
 0x17a   : > { %v518_v33 = vadd.f32 %v517_v32, %v1621_v47  ;;  %v573_v36 = vmax.f32 %v514_v29, 0.0 }
 0x17b   : > { %v574_v35 = vmax.f32 %v516_v31, 0.0 }
 0x17c   : > { %v575_v37 = vmax.f32 %v518_v33, 0.0 }
 0x17d   : > { %v598_v38 = vpack.c.bf16 %v574_v35, %v572_v34  ;;  %v1659_v35 = vld [vmem:[%s1750_s4] ss:$0 sm:$0xff] }
 0x17e   : > { %v599_v39 = vpack.c.bf16 %v575_v37, %v573_v36  ;;  %v521_v40 = vpop.f32.mrb[16].mxu0 }
 0x17f   : > { %v522_v41 = vadd.f32 %v521_v40, %v1619_v46  ;;  %v523_v42 = vpop.f32.mrb[17].mxu0 }
 0x180   : > { %v524_v43 = vadd.f32 %v523_v42, %v1621_v47  ;;  %v525_v44 = vpop.f32.mrb[18].mxu0  ;;  %799 = vmatprep.mubr.bf16.mxu1 %v599_v39 }
 0x181   : > { %v526_v45 = vadd.f32 %v525_v44, %v1619_v46  ;;  %v527_v48 = vpop.f32.mrb[19].mxu0  ;;  %800 = vmatmul.mubr.bf16.gmra.mrb[12].mxu1 %v598_v38  ;;  %v576_v50 = vmax.f32 %v522_v41, 0.0 }
 0x182   : > { %v528_v49 = vadd.f32 %v527_v48, %v1621_v47  ;;  %v577_v52 = vmax.f32 %v524_v43, 0.0 }
 0x183   : > { %v578_v51 = vmax.f32 %v526_v45, 0.0 }
 0x184   : > { %v579_v53 = vmax.f32 %v528_v49, 0.0 }
 0x185   : > { %v600_v54 = vpack.c.bf16 %v578_v51, %v576_v50 }
 0x186   : > { %v601_v55 = vpack.c.bf16 %v579_v53, %v577_v52  ;;  %v531_v56 = vpop.f32.mrb[20].mxu0 }
 0x187   : > { %v532_v57 = vadd.f32 %v531_v56, %v1619_v46  ;;  %v533_v58 = vpop.f32.mrb[21].mxu0 }
 0x188   : > { %v534_v59 = vadd.f32 %v533_v58, %v1621_v47  ;;  %v535_v60 = vpop.f32.mrb[22].mxu0  ;;  %807 = vmatprep.mubr.bf16.mxu1 %v601_v55 }
 0x189   : > { %v536_v61 = vadd.f32 %v535_v60, %v1619_v46  ;;  %v537_v62 = vpop.f32.mrb[23].mxu0  ;;  %808 = vmatmul.mubr.bf16.gmra.mrb[16].mxu1 %v600_v54  ;;  %v580_v0 = vmax.f32 %v532_v57, 0.0 }
 0x18a   : > { %v538_v63 = vadd.f32 %v537_v62, %v1621_v47  ;;  %v581_v2 = vmax.f32 %v534_v59, 0.0 }
 0x18b   : > { %v582_v1 = vmax.f32 %v536_v61, 0.0 }
 0x18c   : > { %v583_v3 = vmax.f32 %v538_v63, 0.0 }
 0x18d   : > { %v602_v4 = vpack.c.bf16 %v582_v1, %v580_v0 }
 0x18e   : > { %v603_v5 = vpack.c.bf16 %v583_v3, %v581_v2  ;;  %v541_v6 = vpop.f32.mrb[24].mxu0 }
 0x18f   : > { %v542_v7 = vadd.f32 %v541_v6, %v1619_v46  ;;  %v543_v8 = vpop.f32.mrb[25].mxu0 }
 0x190   : > { %v544_v9 = vadd.f32 %v543_v8, %v1621_v47  ;;  %v545_v10 = vpop.f32.mrb[26].mxu0  ;;  %815 = vmatprep.mubr.bf16.mxu1 %v603_v5 }
 0x191   : > { %v546_v11 = vadd.f32 %v545_v10, %v1619_v46  ;;  %v547_v12 = vpop.f32.mrb[27].mxu0  ;;  %816 = vmatmul.mubr.bf16.gmra.mrb[20].mxu1 %v602_v4  ;;  %v584_v14 = vmax.f32 %v542_v7, 0.0 }
 0x192   : > { %v548_v13 = vadd.f32 %v547_v12, %v1621_v47  ;;  %v585_v16 = vmax.f32 %v544_v9, 0.0 }
 0x193   : > { %v586_v15 = vmax.f32 %v546_v11, 0.0 }
 0x194   : > { %v587_v17 = vmax.f32 %v548_v13, 0.0 }
 0x195   : > { %v604_v18 = vpack.c.bf16 %v586_v15, %v584_v14 }
 0x196   : > { %v605_v19 = vpack.c.bf16 %v587_v17, %v585_v16  ;;  %v551_v20 = vpop.f32.mrb[28].mxu0 }
 0x197   : > { %v552_v21 = vadd.f32 %v551_v20, %v1619_v46  ;;  %v553_v22 = vpop.f32.mrb[29].mxu0 }
 0x198   : > { %v554_v23 = vadd.f32 %v553_v22, %v1621_v47  ;;  %v555_v24 = vpop.f32.mrb[30].mxu0  ;;  %823 = vmatprep.mubr.bf16.mxu1 %v605_v19 }
 0x199   : > { %v556_v25 = vadd.f32 %v555_v24, %v1619_v46  ;;  %v557_v26 = vpop.f32.mrb[31].mxu0  ;;  %824 = vmatmul.mubr.bf16.gmra.mrb[24].mxu1 %v604_v18  ;;  %v588_v28 = vmax.f32 %v552_v21, 0.0 }
 0x19a   : > { %v558_v27 = vadd.f32 %v557_v26, %v1621_v47  ;;  %v589_v30 = vmax.f32 %v554_v23, 0.0 }
 0x19b   : > { %v590_v29 = vmax.f32 %v556_v25, 0.0 }
 0x19c   : > { %v591_v31 = vmax.f32 %v558_v27, 0.0 }
 0x19d   : > { %v606_v32 = vpack.c.bf16 %v590_v29, %v588_v28 }
 0x19e   : > { %v607_v33 = vpack.c.bf16 %v591_v31, %v589_v30 }
 0x1a0   : > { %831 = vmatprep.mubr.bf16.mxu1 %v607_v33 }
 0x1a1   : > { %832 = vmatmul.mubr.bf16.gmra.mrb[28].mxu1 %v606_v32 }
 0x23c   : > { %v1039_v34 = vpop.f32.mrb[0].mxu1 }
 0x23d   : > { %v1040_v46 = vpop.f32.mrb[1].mxu1 }
 0x23e   : > { %v1041_v36 = vadd.f32 %v1040_v46, %v1039_v34  ;;  %v1042_v37 = vpop.f32.mrb[2].mxu1 }
 0x23f   : > { %v1043_v38 = vpop.f32.mrb[3].mxu1 }
 0x240   : > { %v778_v47 = vadd.f32 %v1041_v36, %v1659_v35  ;;  %v1044_v39 = vadd.f32 %v1043_v38, %v1042_v37 }
 0x242   : > { %840 = vst [vmem:[%s1662_s28] sm:$0xff] %v778_v47  ;;  %v781_v40 = vadd.f32 %v1044_v39, %v1659_v35 }
 0x244   : > { %841 = vst [vmem:[%s1662_s28 + $0x8] sm:$0xff] %v781_v40  ;;  %v1045_v41 = vpop.f32.mrb[4].mxu1 }
 0x245   : > { %v1046_v42 = vpop.f32.mrb[5].mxu1 }
 0x246   : > { %v1047_v43 = vadd.f32 %v1046_v42, %v1045_v41  ;;  %v1048_v44 = vpop.f32.mrb[6].mxu1 }
 0x247   : > { %v1049_v45 = vpop.f32.mrb[7].mxu1 }
 0x248   : > { %v786_v48 = vadd.f32 %v1047_v43, %v1659_v35  ;;  %v1050_v49 = vadd.f32 %v1049_v45, %v1048_v44 }
 0x24a   : > { %842 = vst [vmem:[%s1662_s28 + $0x10] sm:$0xff] %v786_v48  ;;  %v789_v50 = vadd.f32 %v1050_v49, %v1659_v35 }
 0x24c   : > { %843 = vst [vmem:[%s1662_s28 + $0x18] sm:$0xff] %v789_v50  ;;  %v1051_v51 = vpop.f32.mrb[8].mxu1 }
 0x24d   : > { %v1052_v52 = vpop.f32.mrb[9].mxu1 }
 0x24e   : > { %v1053_v53 = vadd.f32 %v1052_v52, %v1051_v51  ;;  %v1054_v54 = vpop.f32.mrb[10].mxu1 }
 0x24f   : > { %v1055_v55 = vpop.f32.mrb[11].mxu1 }
 0x250   : > { %v794_v56 = vadd.f32 %v1053_v53, %v1659_v35  ;;  %v1056_v57 = vadd.f32 %v1055_v55, %v1054_v54 }
 0x252   : > { %844 = vst [vmem:[%s1662_s28 + $0x20] sm:$0xff] %v794_v56  ;;  %v797_v58 = vadd.f32 %v1056_v57, %v1659_v35 }
 0x254   : > { %845 = vst [vmem:[%s1662_s28 + $0x28] sm:$0xff] %v797_v58  ;;  %v1057_v59 = vpop.f32.mrb[12].mxu1 }
 0x255   : > { %v1058_v60 = vpop.f32.mrb[13].mxu1 }
 0x256   : > { %v1059_v61 = vadd.f32 %v1058_v60, %v1057_v59  ;;  %v1060_v62 = vpop.f32.mrb[14].mxu1 }
 0x257   : > { %v1061_v63 = vpop.f32.mrb[15].mxu1 }
 0x258   : > { %v802_v0 = vadd.f32 %v1059_v61, %v1659_v35  ;;  %v1062_v1 = vadd.f32 %v1061_v63, %v1060_v62 }
 0x25a   : > { %846 = vst [vmem:[%s1662_s28 + $0x30] sm:$0xff] %v802_v0  ;;  %v805_v2 = vadd.f32 %v1062_v1, %v1659_v35 }
 0x25c   : > { %847 = vst [vmem:[%s1662_s28 + $0x38] sm:$0xff] %v805_v2  ;;  %v1063_v3 = vpop.f32.mrb[16].mxu1 }
 0x25d   : > { %v1064_v4 = vpop.f32.mrb[17].mxu1 }
 0x25e   : > { %v1065_v5 = vadd.f32 %v1064_v4, %v1063_v3  ;;  %v1066_v6 = vpop.f32.mrb[18].mxu1 }
 0x25f   : > { %v1067_v7 = vpop.f32.mrb[19].mxu1 }
 0x260   : > { %v810_v8 = vadd.f32 %v1065_v5, %v1659_v35  ;;  %v1068_v9 = vadd.f32 %v1067_v7, %v1066_v6 }
 0x262   : > { %848 = vst [vmem:[%s1662_s28 + $0x40] sm:$0xff] %v810_v8  ;;  %v813_v10 = vadd.f32 %v1068_v9, %v1659_v35 }
 0x264   : > { %849 = vst [vmem:[%s1662_s28 + $0x48] sm:$0xff] %v813_v10  ;;  %v1069_v11 = vpop.f32.mrb[20].mxu1 }
 0x265   : > { %v1070_v12 = vpop.f32.mrb[21].mxu1 }
 0x266   : > { %v1071_v13 = vadd.f32 %v1070_v12, %v1069_v11  ;;  %v1072_v14 = vpop.f32.mrb[22].mxu1 }
 0x267   : > { %v1073_v15 = vpop.f32.mrb[23].mxu1 }
 0x268   : > { %v818_v16 = vadd.f32 %v1071_v13, %v1659_v35  ;;  %v1074_v17 = vadd.f32 %v1073_v15, %v1072_v14 }
 0x26a   : > { %850 = vst [vmem:[%s1662_s28 + $0x50] sm:$0xff] %v818_v16  ;;  %v821_v18 = vadd.f32 %v1074_v17, %v1659_v35 }
 0x26c   : > { %851 = vst [vmem:[%s1662_s28 + $0x58] sm:$0xff] %v821_v18  ;;  %v1075_v19 = vpop.f32.mrb[24].mxu1 }
 0x26d   : > { %v1076_v20 = vpop.f32.mrb[25].mxu1 }
 0x26e   : > { %v1077_v21 = vadd.f32 %v1076_v20, %v1075_v19  ;;  %v1078_v22 = vpop.f32.mrb[26].mxu1 }
 0x26f   : > { %v1079_v23 = vpop.f32.mrb[27].mxu1 }
 0x270   : > { %v826_v24 = vadd.f32 %v1077_v21, %v1659_v35  ;;  %v1080_v25 = vadd.f32 %v1079_v23, %v1078_v22 }
 0x272   : > { %852 = vst [vmem:[%s1662_s28 + $0x60] sm:$0xff] %v826_v24  ;;  %v829_v26 = vadd.f32 %v1080_v25, %v1659_v35 }
 0x274   : > { %853 = vst [vmem:[%s1662_s28 + $0x68] sm:$0xff] %v829_v26  ;;  %v1081_v27 = vpop.f32.mrb[28].mxu1 }
 0x275   : > { %v1082_v28 = vpop.f32.mrb[29].mxu1 }
 0x276   : > { %v1083_v29 = vadd.f32 %v1082_v28, %v1081_v27  ;;  %v1084_v30 = vpop.f32.mrb[30].mxu1 }
 0x277   : > { %v1085_v31 = vpop.f32.mrb[31].mxu1 }
 0x278   : > { %v834_v32 = vadd.f32 %v1083_v29, %v1659_v35  ;;  %v1086_v33 = vadd.f32 %v1085_v31, %v1084_v30 }
 0x27a   : > { %854 = vst [vmem:[%s1662_s28 + $0x70] sm:$0xff] %v834_v32  ;;  %v837_v34 = vadd.f32 %v1086_v33, %v1659_v35 }
 0x27c   : > { %855 = vst [vmem:[%s1662_s28 + $0x78] sm:$0xff] %v837_v34 }
 0x27d   : > { %1308 = shalt.err (!%p1305_p2)
}
 0x27e   : > { %s1309_s24 = scalar_lea.hbm %s1697_s23, 2048  ;;  %s1313_s13 = scalar_lea.hbm %s1751_s5, 4096 }
 0x27f   : > { %p1310_p13 = scmp.ne.s32.totalorder %s1697_s23, %s1309_s24  ;;  %p1314_p4 = scmp.lt.u32.totalorder %s1697_s23, %s1751_s5 }
 0x280   : > { %p1315_p7 = scmp.lt.u32.totalorder %s1313_s13, %s1309_s24  ;;  %p1317_p11 = scmp.lt.u32.totalorder %s1309_s24, %s1697_s23 }
 0x281   : > { %p1311_p6 = pnand %p1310_p13, %p1765_p0 }
 0x282   : > { %p1316_p8 = por %p1315_p7, %p1314_p4 }
 0x283   : > { %p1312_p10 = pneg %p1311_p6 }
 0x284   : > { %p1318_p1 = por %p1317_p11, %p1316_p8 }
 0x286   : > { %p1319_p3 = pnand %p1318_p1, %p1312_p10 }
 0x288   : > { %1322 = shalt.err (!%p1319_p3)
}
 0x289   : > { %s1376_s14 = smov 128   ;;  %s1377_s30 = smov 8  }
 0x28a   : > { %1097 = dma.vmem_to_hbm [thread:$0]  (%p1765_p0), %s1699_s15, 2048, %s1697_s23, %s857_s22, %s1376_s14, %s1376_s14, %s1377_s30  }
 0x28b PF: > { %s885_s11 = sand.u32 1, %s1353_s18   ;;  %p1766_p5 = scmp.ne.s32.totalorder %s1756_s25, 0 }
 0x28c   : > { %p1767_p9 = scmp.ge.s32.totalorder %s1365_s21, 2  ;;  %s886_s7 = scalar_lea.sflag [#allocation4], %s885_s11 }
 0x28e   : > { %p1111_p12 = pnand %p1767_p9, %p1766_p5 }
 0x290   : > { %1348 = dma.done.wait (!%p1111_p12), %s886_s7, 2048  }
 0x291   : > { %1350 = vsyncadd (!%p1111_p12), %s886_s7, 4294965248  ;;  %p19_p2 = scmp.ge.s32.totalorder %s1521_s16, 4   ;;  %s1768_s18 = smov %s1357_s19 }
 0x292   : > { %s1769_s19 = smov %s1361_s20  ;;  %s1770_s20 = smov %s1530_s27 }
 0x293   : > { %s1771_s21 = smov %s1521_s16  ;;  %21 = sbr.rel (!%p19_p2) target bundleno = 6 (0x6), region = 93 }
 0x29a   :  { %891 = vsyncpa [#allocation3], 1 }
 0x29b   :  { %893 = vsyncpa [#allocation3 + $0x1], 1 }
 0x29c   :  { %894 = vsyncpa [#allocation6], 1 }
 0x29d   :  { %895 = vsyncpa [#allocation4], 1 }
 0x29e   :  { %897 = vsyncpa [#allocation4 + $0x1], 1 }

</bundles_post_ra>
